<compile_context>
chip_gen: v7x
topology: tpu7x:2x2x1
jax: 0.10.0
libtpu: 0.0.40
codegen_flags: <defaults>
</compile_context>

<pallas_src>
import jax
import jax.numpy as jnp
from jax.experimental import pallas as pl
from jax.experimental.pallas import tpu as pltpu

_LANE = 128


def _round_up(n, m):
    return -(-n // m) * m


def _pick_cols(total):
    """Lane-dense column count (multiple of 128) that divides `total`."""
    if total % 512 == 0:          # measured sweet spot
        return 512
    for c in range(4096, _LANE - 1, -_LANE):
        if total % c == 0:
            return c
    return None


def _device_hints():
    """(is_v7x, bytes_per_pipelined_buffer) — safe fallback if query fails."""
    kind = ""
    try:
        kind = jax.devices()[0].device_kind.lower()
    except Exception:
        pass
    is_v7 = "v7" in kind
    # ~2 MiB/buffer everywhere (12 MiB total, fits v5e's 16 MiB default scoped
    # VMEM); ~4 MiB on v7x (24 MiB total, fits its 32 MiB scoped default).
    bytes_per_buffer = (4 << 20) if is_v7 else (2 << 20)
    return is_v7, bytes_per_buffer


def _multiply_kernel(x_ref, y_ref, o_ref):
    # Hot path: elementwise product on the VPU, one VMEM tile per grid step.
    o_ref[...] = x_ref[...] * y_ref[...]


def _pallas_multiply_2d(x2, y2, *, balance_two_cores, bytes_per_buffer):
    """Elementwise multiply of two equal-shape 2D arrays (rows, cols)."""
    rows, cols = x2.shape
    itemsize = jnp.dtype(x2.dtype).itemsize
    # Sublane multiple per dtype: 8 (f32), 16 (bf16/f16), 32 (int8/fp8).
    sub = max(8, 32 // itemsize)

    # Max rows per tile so one pipelined buffer is ~bytes_per_buffer.
    tm = max(sub, bytes_per_buffer // (cols * itemsize))

    # Distribute rows evenly over the needed step count (no tiny ragged tail).
    steps = pl.cdiv(rows, tm)
    total_bytes = rows * cols * itemsize
    if balance_two_cores and total_bytes >= (1 << 20) and rows >= 2 * sub:
        # v7x megacore: make sure both TensorCores get work...
        steps = max(steps, 2)
    if balance_two_cores and steps > 1 and steps % 2:
        # ...and an equal number of grid steps each.
        steps += 1

    if steps <= 1:
        block_rows, grid_rows = rows, 1  # full-extent block, always legal
    else:
        block_rows = min(rows, _round_up(pl.cdiv(rows, steps), sub))
        grid_rows = pl.cdiv(rows, block_rows)

    cost = pl.CostEstimate(
        flops=rows * cols,
        transcendentals=0,
        bytes_accessed=3 * rows * cols * itemsize,
    )

    return pl.pallas_call(
        _multiply_kernel,
        out_shape=jax.ShapeDtypeStruct((rows, cols), x2.dtype),
        grid=(grid_rows,),
        in_specs=[
            pl.BlockSpec((block_rows, cols), lambda i: (i, 0)),
            pl.BlockSpec((block_rows, cols), lambda i: (i, 0)),
        ],
        out_specs=pl.BlockSpec((block_rows, cols), lambda i: (i, 0)),
        compiler_params=pltpu.CompilerParams(
            # Every grid step is independent -> v7x shards across its 2 TCs.
            dimension_semantics=("parallel",)
        ),
        cost_estimate=cost,
    )(x2, y2)


def multiply(x, y, *, min_pallas_bytes=2 << 20):
    """Elementwise x * y via a Pallas TPU kernel.

    x and y must have equal shapes and dtypes (no broadcasting — matches the
    usage contract of the PyTorch `Multiply` module).

    Tensors below `min_pallas_bytes`, or whose element count has no 128-lane
    divisor, use XLA's fused elementwise multiply (already at HBM roofline,
    and cheaper than a kernel launch for small sizes). Pass 0 to force the
    Pallas path whenever a lane-dense layout exists.
    """
    assert x.shape == y.shape, "Multiply kernel expects equal shapes (no broadcasting)"
    assert x.dtype == y.dtype, "Multiply kernel expects matching dtypes"

    total = x.size
    if total == 0:
        return x * y

    itemsize = jnp.dtype(x.dtype).itemsize
    if total * itemsize < min_pallas_bytes:
        return x * y

    cols = _pick_cols(total)
    if cols is None:
        # No 128-lane divisor: padding would ~double HBM traffic, and fused
        # XLA elementwise already hits roofline for this mem-bound op.
        return x * y

    rows = total // cols
    is_v7, bytes_per_buffer = _device_hints()
    out2 = _pallas_multiply_2d(
        x.reshape(rows, cols),
        y.reshape(rows, cols),
        balance_two_cores=is_v7,
        bytes_per_buffer=bytes_per_buffer,
    )
    return out2.reshape(x.shape)


if __name__ == "__main__":
    key = jax.random.PRNGKey(0)
    k1, k2, k3, k4, k5, k6, k7, k8 = jax.random.split(key, 8)

    # 1) Small NCHW tensor consistent with the module (batch=2, channels=4,
    #    spatial=16x16). Forces the Pallas path: single lane-dense block
    #    (4 rows x 512 lanes).
    x = jax.random.normal(k1, (2, 4, 16, 16), dtype=jnp.float32)
    y = jax.random.normal(k2, (2, 4, 16, 16), dtype=jnp.float32)
    out = multiply(x, y, min_pallas_bytes=0)
    jax.block_until_ready(out)
    assert out.shape == x.shape and out.dtype == x.dtype
    assert jnp.allclose(out, x * y, atol=1e-6, rtol=1e-6)

    # 2) Larger tensor: multi-step pipelined grid with evenly balanced blocks
    #    (2560 rows of 512 lanes -> several ~2 MiB tiles).
    x = jax.random.normal(k3, (2560, 512), dtype=jnp.float32)
    y = jax.random.normal(k4, (2560, 512), dtype=jnp.float32)
    out = multiply(x, y, min_pallas_bytes=0)
    jax.block_until_ready(out)
    assert jnp.allclose(out, x * y, atol=1e-6, rtol=1e-6)

    # 3) bf16 input: exercises the wider sublane-multiple rounding.
    x = jax.random.normal(k5, (650, 512), dtype=jnp.bfloat16)
    y = jax.random.normal(k6, (650, 512), dtype=jnp.bfloat16)
    out = multiply(x, y, min_pallas_bytes=0)
    jax.block_until_ready(out)
    assert jnp.allclose(out.astype(jnp.float32),
                        (x * y).astype(jnp.float32), atol=1e-2, rtol=1e-2)

    # 4) Odd element count not divisible by 128: clean XLA fallback (no pad).
    x = jax.random.normal(k7, (3, 5, 7, 13), dtype=jnp.float32)
    y = jax.random.normal(k8, (3, 5, 7, 13), dtype=jnp.float32)
    out = multiply(x, y, min_pallas_bytes=0)
    jax.block_until_ready(out)
    assert jnp.allclose(out, x * y, atol=1e-6, rtol=1e-6)

    print("KERNEL_OK")
</pallas_src>

<mosaic_0001>
module attributes {stable_mosaic.version = 11 : i64} {
  func.func @_multiply_kernel(%arg0: i32, %arg1: memref<4x512xf32, #tpu.memory_space<vmem>>, %arg2: memref<4x512xf32, #tpu.memory_space<vmem>>, %arg3: memref<4x512xf32, #tpu.memory_space<vmem>>) attributes {dimension_semantics = [#tpu.dimension_semantics<parallel>], iteration_bounds = array<i64: 1>, scalar_prefetch = 0 : i64, scratch_operands = 0 : i64, tpu.core_type = #tpu.core_type<tc>, window_params = [{transform_indices = @transform_0, window_bounds = array<i64: 4, 512>}, {transform_indices = @transform_1, window_bounds = array<i64: 4, 512>}, {transform_indices = @transform_2, window_bounds = array<i64: 4, 512>}]} {
    %c0 = arith.constant 0 : index
    %c0_0 = arith.constant 0 : index
    %0 = vector.load %arg1[%c0, %c0_0] : memref<4x512xf32, #tpu.memory_space<vmem>>, vector<4x512xf32>
    %c0_1 = arith.constant 0 : index
    %c0_2 = arith.constant 0 : index
    %1 = vector.load %arg2[%c0_1, %c0_2] : memref<4x512xf32, #tpu.memory_space<vmem>>, vector<4x512xf32>
    %2 = arith.mulf %0, %1 : vector<4x512xf32>
    %c0_3 = arith.constant 0 : index
    %c0_4 = arith.constant 0 : index
    %3 = vector.load %arg3[%c0_3, %c0_4] : memref<4x512xf32, #tpu.memory_space<vmem>>, vector<4x512xf32>
    tpu.vector_store %arg3[%c0_3, %c0_4], %2 {strides = array<i32>} : memref<4x512xf32, #tpu.memory_space<vmem>>, vector<4x512xf32>,
    return
  }
  func.func @transform_0(%arg0: i32) -> (i32, i32) {
    %c0_i32 = arith.constant 0 : i32
    %c0_i32_0 = arith.constant 0 : i32
    return %arg0, %c0_i32 : i32, i32
  }
  func.func @transform_1(%arg0: i32) -> (i32, i32) {
    %c0_i32 = arith.constant 0 : i32
    %c0_i32_0 = arith.constant 0 : i32
    return %arg0, %c0_i32 : i32, i32
  }
  func.func @transform_2(%arg0: i32) -> (i32, i32) {
    %c0_i32 = arith.constant 0 : i32
    %c0_i32_0 = arith.constant 0 : i32
    return %arg0, %c0_i32 : i32, i32
  }
}

</mosaic_0001>

<bundles_post_ra>
// kernel: tpu_custom_call.1
= control target key start
LH: loop header
LB: loop body
LE: loop exit
PB: predicated region body
PF: predicated region fallthrough
CT: control target
= control target key end

     0   :  { %7 = vsyncpa [#allocation3], 0  ;;  %s189_s0 = inlined_call_operand.hbm [shape: f32[4,512], index: 0, kind: input, shape index: {}]   ;;  %s190_s1 = inlined_call_operand.hbm [shape: f32[4,512], index: 1, kind: input, shape index: {}]   ;;  %s191_s2 = inlined_call_operand.hbm [shape: f32[4,512], index: 2, kind: output, shape index: {}]  }
   0x1   :  { %8 = vsyncpa [#allocation6], 0 }
   0x2   :  { %9 = vsyncpa [#allocation4], 0  ;;  %s135_s9 = smov [#allocation2]   ;;  %s136_s11 = smov [#allocation5]  }
   0x3   :  { %s16_s10 = sshll.u32 %s135_s9, 4  ;;  %s26_s12 = sshll.u32 %s136_s11, 4  ;;  %s17_s10 = int_to_ptr.vmem [resolvable:$true] %s16_s10  ;;  %s27_s12 = int_to_ptr.vmem [resolvable:$true] %s26_s12 }
   0x4   :  { %s63_s15 = scalar_lea.hbm %s189_s0, 256 }
   0x5   :  { %p64_p0 = scmp.ne.s32.totalorder %s189_s0, %s63_s15  ;;  %p67_p1 = scmp.lt.u32.totalorder %s63_s15, %s189_s0 }
   0x7   :  { %p69_p2 = pnand %p67_p1, %p64_p0 }
   0x9   :  { %72 = shalt.err (!%p69_p2)
}
   0xa   :  { %s73_s20 = scalar_lea.vmem %s17_s10, 256  ;;  %p78_p4 = scmp.lt.s32.totalorder %s17_s10, %s17_s10 }
   0xb   :  { %p74_p3 = scmp.ne.s32.totalorder %s17_s10, %s73_s20  ;;  %p79_p5 = scmp.lt.s32.totalorder %s73_s20, %s73_s20 }
   0xd   :  { %p80_p6 = por %p79_p5, %p78_p4 }
   0xf   :  { %p81_p7 = pnand %p80_p6, %p74_p3 }
  0x11   :  { %84 = shalt.err (!%p81_p7)
}
  0x12   :  { %19 = dma.hbm_to_vmem [thread:$0]  %s189_s0, 256, %s17_s10, [#allocation3]  }
  0x13   :  { %s85_s25 = scalar_lea.hbm %s190_s1, 256 }
  0x14   :  { %p86_p8 = scmp.ne.s32.totalorder %s190_s1, %s85_s25  ;;  %p89_p9 = scmp.lt.u32.totalorder %s85_s25, %s190_s1 }
  0x16   :  { %p91_p10 = pnand %p89_p9, %p86_p8 }
  0x18   :  { %94 = shalt.err (!%p91_p10)
}
  0x19   :  { %s95_s30 = scalar_lea.vmem %s27_s12, 256  ;;  %p100_p12 = scmp.lt.s32.totalorder %s27_s12, %s27_s12 }
  0x1a   :  { %p96_p11 = scmp.ne.s32.totalorder %s27_s12, %s95_s30  ;;  %p101_p13 = scmp.lt.s32.totalorder %s95_s30, %s95_s30 }
  0x1c   :  { %p102_p0 = por %p101_p13, %p100_p12 }
  0x1e   :  { %p103_p1 = pnand %p102_p0, %p96_p11 }
  0x20   :  { %106 = shalt.err (!%p103_p1)
}
  0x21   :  { %29 = dma.hbm_to_vmem [thread:$0]  %s190_s1, 256, %s27_s12, [#allocation6]  }
  0x22   :  { %129 = dma.done.wait [#allocation3], 256  }
  0x23   :  { %130 = vsyncadd [#allocation3], 4294967040 }
  0x24   :  { %131 = dma.done.wait [#allocation6], 256  }
  0x25   :  { %132 = vsyncadd [#allocation6], 4294967040  ;;  %s137_s4 = smov [#allocation7]   ;;  %v36_v0 = vld [vmem:[#allocation2] sm:$0xff]  ;;  %v38_v1 = vld [vmem:[#allocation5] sm:$0xff] }
  0x26   :  { %s50_s5 = sshll.u32 %s137_s4, 4  ;;  %v37_v2 = vld [vmem:[#allocation2 + $0x8] sm:$0xff]  ;;  %v40_v3 = vmul.f32 %v38_v1, %v36_v0  ;;  %v39_v4 = vld [vmem:[#allocation5 + $0x8] sm:$0xff]  ;;  %s51_s5 = int_to_ptr.vmem [resolvable:$true] %s50_s5 }
  0x27   :  { %v41_v5 = vmul.f32 %v39_v4, %v37_v2  ;;  %s107_s6 = scalar_lea.vmem %s51_s5, 256  ;;  %p112_p3 = scmp.lt.s32.totalorder %s51_s5, %s51_s5 }
  0x28   :  { %42 = vst [vmem:[#allocation7] sm:$0xff] %v40_v3  ;;  %p108_p2 = scmp.ne.s32.totalorder %s51_s5, %s107_s6  ;;  %p113_p4 = scmp.lt.s32.totalorder %s107_s6, %s107_s6 }
  0x29   :  { %43 = vst [vmem:[#allocation7 + $0x8] sm:$0xff] %v41_v5 }
  0x2a   :  { %p114_p5 = por %p113_p4, %p112_p3 }
  0x2c   :  { %p115_p6 = pnand %p114_p5, %p108_p2 }
  0x2e   :  { %118 = shalt.err (!%p115_p6)
}
  0x2f   :  { %s119_s8 = scalar_lea.hbm %s191_s2, 256 }
  0x30   :  { %p120_p7 = scmp.ne.s32.totalorder %s191_s2, %s119_s8  ;;  %p123_p8 = scmp.lt.u32.totalorder %s119_s8, %s191_s2 }
  0x32   :  { %p125_p9 = pnand %p123_p8, %p120_p7 }
  0x34   :  { %128 = shalt.err (!%p125_p9)
}
  0x35   :  { %53 = dma.vmem_to_hbm [thread:$0]  %s51_s5, 256, %s191_s2, [#allocation4]  }
  0x36   :  { %133 = dma.done.wait [#allocation4], 256  }
  0x37   :  { %134 = vsyncadd [#allocation4], 4294967040 }
  0x38   :  { %57 = vsyncpa [#allocation3], 1 }
  0x39   :  { %58 = vsyncpa [#allocation6], 1 }
  0x3a   :  { %59 = vsyncpa [#allocation4], 1 }

</bundles_post_ra>
